<compile_context>
chip_gen: v7x
topology: tpu7x:2x2x1
jax: 0.10.0
libtpu: 0.0.40
codegen_flags: <defaults>
</compile_context>

<pallas_src>
import functools

import jax
import jax.numpy as jnp
import numpy as np
from jax.experimental import pallas as pl
from jax.experimental.pallas import tpu as pltpu


def bottleneck_kernel(x_ref, masks_ref, w1_ref, b1_ref, w2_ref, b2_ref,
                      w3_ref, b3_ref, out_ref, *, H, W):
    # x_ref:     (C, HW)      lane-dense slab for one image (also the residual)
    # masks_ref: (8, HW)      precomputed boundary masks, ordered (ky, kx) skipping center
    # w1_ref:    (Ch, C)      conv1 1x1 weight
    # b1_ref:    (Ch, 1)
    # w2_ref:    (9, Ch, Ch)  conv2 3x3 weight, w2_ref[ky*3+kx] = W2[:, :, ky, kx]
    # b2_ref:    (Ch, 1)
    # w3_ref:    (C, Ch)      conv3 1x1 weight
    # b3_ref:    (C, 1)
    # out_ref:   (C, HW)
    HW = H * W

    x2d = x_ref[...]                                              # (C, HW)

    # ---- conv1 (1x1) as one MXU matmul, + bias + ReLU ------------------------
    h1 = jnp.dot(w1_ref[...], x2d, preferred_element_type=jnp.float32)
    h1 = jnp.maximum(h1 + b1_ref[...], 0.0)                       # (Ch, HW)

    # ---- conv2 (3x3, pad=1): 9 accumulated matmuls over lane rotations -------
    # Center tap first (no roll, no mask).
    acc = jnp.dot(w2_ref[4], h1, preferred_element_type=jnp.float32)
    m = 0
    for ky in range(3):
        for kx in range(3):
            dy, dx = ky - 1, kx - 1
            off = dy * W + dx
            if off == 0:
                continue
            # shifted[p] = h1[p + off]; wrap-around only hits masked positions.
            shifted = pltpu.roll(h1, shift=(-off) % HW, axis=1)
            shifted = shifted * masks_ref[m:m + 1, :]             # (Ch, HW)
            acc = acc + jnp.dot(w2_ref[ky * 3 + kx], shifted,
                                preferred_element_type=jnp.float32)
            m += 1
    h2 = jnp.maximum(acc + b2_ref[...], 0.0)                      # (Ch, HW)

    # ---- conv3 (1x1) + bias + residual + final ReLU, one lane-dense store ----
    y = jnp.dot(w3_ref[...], h2, preferred_element_type=jnp.float32)
    out_ref[...] = jnp.maximum(y + b3_ref[...] + x2d, 0.0)        # (C, HW)


@jax.jit
def bottleneck_forward(x, w1, b1, w2, b2, w3, b3):
    # x: (N, C, H, W); weights in PyTorch Conv2d layouts:
    #   w1 (Ch, C, 1, 1), w2 (Ch, Ch, 3, 3), w3 (C, Ch, 1, 1); biases 1-D.
    N, C, H, W = x.shape
    Ch = w1.shape[0]
    HW = H * W

    # Free (contiguous) reshape; no transpose.
    x3d = x.reshape(N, C, HW)

    # Matmul-ready weights / lane-broadcastable biases.
    w1m = w1.reshape(Ch, C)
    w2m = w2.transpose(2, 3, 0, 1).reshape(9, Ch, Ch)    # [ky*3+kx] = W2[:,:,ky,kx]
    w3m = w3.reshape(C, Ch)
    b1c = b1.reshape(Ch, 1).astype(jnp.float32)
    b2c = b2.reshape(Ch, 1).astype(jnp.float32)
    b3c = b3.reshape(C, 1).astype(jnp.float32)

    # Precompute the 8 boundary-validity masks (static H, W) -> kernel constant.
    hh, ww = np.meshgrid(np.arange(H), np.arange(W), indexing="ij")
    hh = hh.reshape(-1)
    ww = ww.reshape(-1)
    rows = []
    for ky in range(3):
        for kx in range(3):
            dy, dx = ky - 1, kx - 1
            if dy == 0 and dx == 0:
                continue
            rows.append(((hh + dy >= 0) & (hh + dy < H) &
                         (ww + dx >= 0) & (ww + dx < W)).astype(np.float32))
    masks = jnp.asarray(np.stack(rows, axis=0))          # (8, HW)

    grid_spec = pltpu.PrefetchScalarGridSpec(
        num_scalar_prefetch=0,
        grid=(N,),                                        # one image per grid step
        in_specs=[
            pl.BlockSpec((None, C, HW), lambda n: (n, 0, 0)),     # x (per image)
            pl.BlockSpec((8, HW), lambda n: (0, 0)),              # masks (resident)
            pl.BlockSpec((Ch, C), lambda n: (0, 0)),              # w1
            pl.BlockSpec((Ch, 1), lambda n: (0, 0)),              # b1
            pl.BlockSpec((9, Ch, Ch), lambda n: (0, 0, 0)),       # w2
            pl.BlockSpec((Ch, 1), lambda n: (0, 0)),              # b2
            pl.BlockSpec((C, Ch), lambda n: (0, 0)),              # w3
            pl.BlockSpec((C, 1), lambda n: (0, 0)),               # b3
        ],
        out_specs=pl.BlockSpec((None, C, HW), lambda n: (n, 0, 0)),
    )
    out3d = pl.pallas_call(
        functools.partial(bottleneck_kernel, H=H, W=W),
        out_shape=jax.ShapeDtypeStruct((N, C, HW), jnp.float32),
        grid_spec=grid_spec,
        compiler_params=pltpu.CompilerParams(dimension_semantics=("parallel",)),
    )(x3d, masks, w1m, b1c, w2m, b2c, w3m, b3c)

    return out3d.reshape(N, C, H, W)                      # free reshape back to NCHW


def bottleneck_ref(x, w1, b1, w2, b2, w3, b3):
    """Pure-JAX reference matching the PyTorch forward exactly."""
    def conv(h, w, pad):
        return jax.lax.conv_general_dilated(
            h, w, window_strides=(1, 1), padding=[(pad, pad), (pad, pad)],
            dimension_numbers=("NCHW", "OIHW", "NCHW"))
    h = jax.nn.relu(conv(x, w1, 0) + b1[None, :, None, None])
    h = jax.nn.relu(conv(h, w2, 1) + b2[None, :, None, None])
    y = conv(h, w3, 0) + b3[None, :, None, None]
    return jax.nn.relu(y + x)


if __name__ == "__main__":
    N, C, Ch, H, W = 2, 4, 8, 16, 16        # channel=4, hidden_c=8

    key = jax.random.PRNGKey(0)
    ks = jax.random.split(key, 7)
    x  = jax.random.normal(ks[0], (N, C, H, W),  jnp.float32)
    w1 = jax.random.normal(ks[1], (Ch, C, 1, 1), jnp.float32) * 0.2   # conv1 weight
    b1 = jax.random.normal(ks[2], (Ch,),         jnp.float32) * 0.1
    w2 = jax.random.normal(ks[3], (Ch, Ch, 3, 3), jnp.float32) * 0.1  # conv2 weight
    b2 = jax.random.normal(ks[4], (Ch,),         jnp.float32) * 0.1
    w3 = jax.random.normal(ks[5], (C, Ch, 1, 1), jnp.float32) * 0.2   # conv3 weight
    b3 = jax.random.normal(ks[6], (C,),          jnp.float32) * 0.1

    out = bottleneck_forward(x, w1, b1, w2, b2, w3, b3)
    out = jax.block_until_ready(out)

    ref = bottleneck_ref(x, w1, b1, w2, b2, w3, b3)
    np.testing.assert_allclose(np.asarray(out), np.asarray(ref), rtol=1e-4, atol=1e-4)

    print("KERNEL_OK")
</pallas_src>

<mosaic_0001>
module attributes {stable_mosaic.version = 11 : i64} {
  func.func @bottleneck_kernel(%arg0: i32, %arg1: memref<1x4x256xf32, #tpu.memory_space<vmem>>, %arg2: memref<8x256xf32, #tpu.memory_space<vmem>>, %arg3: memref<8x4xf32, #tpu.memory_space<vmem>>, %arg4: memref<8x1xf32, #tpu.memory_space<vmem>>, %arg5: memref<9x8x8xf32, #tpu.memory_space<vmem>>, %arg6: memref<8x1xf32, #tpu.memory_space<vmem>>, %arg7: memref<4x8xf32, #tpu.memory_space<vmem>>, %arg8: memref<4x1xf32, #tpu.memory_space<vmem>>, %arg9: memref<1x4x256xf32, #tpu.memory_space<vmem>>) attributes {dimension_semantics = [#tpu.dimension_semantics<parallel>], iteration_bounds = array<i64: 2>, scalar_prefetch = 0 : i64, scratch_operands = 0 : i64, tpu.core_type = #tpu.core_type<tc>, window_params = [{transform_indices = @transform_0, window_bounds = array<i64: 1, 4, 256>}, {pipeline_mode = #tpu.pipeline_mode<synchronous>, transform_indices = @transform_1, window_bounds = array<i64: 8, 256>}, {pipeline_mode = #tpu.pipeline_mode<synchronous>, transform_indices = @transform_2, window_bounds = array<i64: 8, 4>}, {pipeline_mode = #tpu.pipeline_mode<synchronous>, transform_indices = @transform_3, window_bounds = array<i64: 8, 1>}, {pipeline_mode = #tpu.pipeline_mode<synchronous>, transform_indices = @transform_4, window_bounds = array<i64: 9, 8, 8>}, {pipeline_mode = #tpu.pipeline_mode<synchronous>, transform_indices = @transform_5, window_bounds = array<i64: 8, 1>}, {pipeline_mode = #tpu.pipeline_mode<synchronous>, transform_indices = @transform_6, window_bounds = array<i64: 4, 8>}, {pipeline_mode = #tpu.pipeline_mode<synchronous>, transform_indices = @transform_7, window_bounds = array<i64: 4, 1>}, {transform_indices = @transform_8, window_bounds = array<i64: 1, 4, 256>}]} {
    %c0 = arith.constant 0 : index
    %c0_0 = arith.constant 0 : index
    %c0_1 = arith.constant 0 : index
    %0 = vector.load %arg1[%c0, %c0_0, %c0_1] : memref<1x4x256xf32, #tpu.memory_space<vmem>>, vector<1x4x256xf32>
    %1 = vector.shape_cast %0 : vector<1x4x256xf32> to vector<4x256xf32>
    %c0_2 = arith.constant 0 : index
    %c0_3 = arith.constant 0 : index
    %2 = vector.load %arg3[%c0_2, %c0_3] : memref<8x4xf32, #tpu.memory_space<vmem>>, vector<8x4xf32>
    %cst = arith.constant dense<0.000000e+00> : vector<8x256xf32>
    %3 = tpu.matmul %2, %1, %cst {dimension_numbers = #tpu.dot_dimension_numbers<[1], [0], [0], [1], [0, 0, 1, 1], [], []>} : vector<8x4xf32>, vector<4x256xf32>, vector<8x256xf32> -> vector<8x256xf32>
    %c0_4 = arith.constant 0 : index
    %c0_5 = arith.constant 0 : index
    %4 = vector.load %arg4[%c0_4, %c0_5] : memref<8x1xf32, #tpu.memory_space<vmem>>, vector<8x1xf32>
    %5 = vector.broadcast %4 : vector<8x1xf32> to vector<8x256xf32>
    %6 = arith.addf %3, %5 : vector<8x256xf32>
    %cst_6 = arith.constant 0.000000e+00 : f32
    %7 = vector.broadcast %cst_6 : f32 to vector<8x256xf32>
    %8 = arith.maximumf %6, %7 : vector<8x256xf32>
    %c4 = arith.constant 4 : index
    %c0_7 = arith.constant 0 : index
    %c0_8 = arith.constant 0 : index
    %9 = vector.load %arg5[%c4, %c0_7, %c0_8] : memref<9x8x8xf32, #tpu.memory_space<vmem>>, vector<1x8x8xf32>
    %10 = vector.shape_cast %9 : vector<1x8x8xf32> to vector<8x8xf32>
    %cst_9 = arith.constant dense<0.000000e+00> : vector<8x256xf32>
    %11 = tpu.matmul %10, %8, %cst_9 {dimension_numbers = #tpu.dot_dimension_numbers<[1], [0], [0], [1], [0, 0, 1, 1], [], []>} : vector<8x8xf32>, vector<8x256xf32>, vector<8x256xf32> -> vector<8x256xf32>
    %c17_i32 = arith.constant 17 : i32
    %12 = tpu.dynamic_rotate %8 by %c17_i32 dim 1 : vector<8x256xf32>, i32 -> vector<8x256xf32>
    %c0_10 = arith.constant 0 : index
    %c0_11 = arith.constant 0 : index
    %13 = vector.load %arg2[%c0_10, %c0_11] : memref<8x256xf32, #tpu.memory_space<vmem>>, vector<1x256xf32>
    %14 = vector.broadcast %13 : vector<1x256xf32> to vector<8x256xf32>
    %15 = arith.mulf %12, %14 : vector<8x256xf32>
    %c0_12 = arith.constant 0 : index
    %c0_13 = arith.constant 0 : index
    %c0_14 = arith.constant 0 : index
    %16 = vector.load %arg5[%c0_12, %c0_13, %c0_14] : memref<9x8x8xf32, #tpu.memory_space<vmem>>, vector<1x8x8xf32>
    %17 = vector.shape_cast %16 : vector<1x8x8xf32> to vector<8x8xf32>
    %cst_15 = arith.constant dense<0.000000e+00> : vector<8x256xf32>
    %18 = tpu.matmul %17, %15, %cst_15 {dimension_numbers = #tpu.dot_dimension_numbers<[1], [0], [0], [1], [0, 0, 1, 1], [], []>} : vector<8x8xf32>, vector<8x256xf32>, vector<8x256xf32> -> vector<8x256xf32>
    %19 = arith.addf %11, %18 : vector<8x256xf32>
    %c16_i32 = arith.constant 16 : i32
    %20 = tpu.dynamic_rotate %8 by %c16_i32 dim 1 : vector<8x256xf32>, i32 -> vector<8x256xf32>
    %c1 = arith.constant 1 : index
    %c0_16 = arith.constant 0 : index
    %21 = vector.load %arg2[%c1, %c0_16] : memref<8x256xf32, #tpu.memory_space<vmem>>, vector<1x256xf32>
    %22 = vector.broadcast %21 : vector<1x256xf32> to vector<8x256xf32>
    %23 = arith.mulf %20, %22 : vector<8x256xf32>
    %c1_17 = arith.constant 1 : index
    %c0_18 = arith.constant 0 : index
    %c0_19 = arith.constant 0 : index
    %24 = vector.load %arg5[%c1_17, %c0_18, %c0_19] : memref<9x8x8xf32, #tpu.memory_space<vmem>>, vector<1x8x8xf32>
    %25 = vector.shape_cast %24 : vector<1x8x8xf32> to vector<8x8xf32>
    %cst_20 = arith.constant dense<0.000000e+00> : vector<8x256xf32>
    %26 = tpu.matmul %25, %23, %cst_20 {dimension_numbers = #tpu.dot_dimension_numbers<[1], [0], [0], [1], [0, 0, 1, 1], [], []>} : vector<8x8xf32>, vector<8x256xf32>, vector<8x256xf32> -> vector<8x256xf32>
    %27 = arith.addf %19, %26 : vector<8x256xf32>
    %c15_i32 = arith.constant 15 : i32
    %28 = tpu.dynamic_rotate %8 by %c15_i32 dim 1 : vector<8x256xf32>, i32 -> vector<8x256xf32>
    %c2 = arith.constant 2 : index
    %c0_21 = arith.constant 0 : index
    %29 = vector.load %arg2[%c2, %c0_21] : memref<8x256xf32, #tpu.memory_space<vmem>>, vector<1x256xf32>
    %30 = vector.broadcast %29 : vector<1x256xf32> to vector<8x256xf32>
    %31 = arith.mulf %28, %30 : vector<8x256xf32>
    %c2_22 = arith.constant 2 : index
    %c0_23 = arith.constant 0 : index
    %c0_24 = arith.constant 0 : index
    %32 = vector.load %arg5[%c2_22, %c0_23, %c0_24] : memref<9x8x8xf32, #tpu.memory_space<vmem>>, vector<1x8x8xf32>
    %33 = vector.shape_cast %32 : vector<1x8x8xf32> to vector<8x8xf32>
    %cst_25 = arith.constant dense<0.000000e+00> : vector<8x256xf32>
    %34 = tpu.matmul %33, %31, %cst_25 {dimension_numbers = #tpu.dot_dimension_numbers<[1], [0], [0], [1], [0, 0, 1, 1], [], []>} : vector<8x8xf32>, vector<8x256xf32>, vector<8x256xf32> -> vector<8x256xf32>
    %35 = arith.addf %27, %34 : vector<8x256xf32>
    %c1_i32 = arith.constant 1 : i32
    %36 = tpu.dynamic_rotate %8 by %c1_i32 dim 1 : vector<8x256xf32>, i32 -> vector<8x256xf32>
    %c3 = arith.constant 3 : index
    %c0_26 = arith.constant 0 : index
    %37 = vector.load %arg2[%c3, %c0_26] : memref<8x256xf32, #tpu.memory_space<vmem>>, vector<1x256xf32>
    %38 = vector.broadcast %37 : vector<1x256xf32> to vector<8x256xf32>
    %39 = arith.mulf %36, %38 : vector<8x256xf32>
    %c3_27 = arith.constant 3 : index
    %c0_28 = arith.constant 0 : index
    %c0_29 = arith.constant 0 : index
    %40 = vector.load %arg5[%c3_27, %c0_28, %c0_29] : memref<9x8x8xf32, #tpu.memory_space<vmem>>, vector<1x8x8xf32>
    %41 = vector.shape_cast %40 : vector<1x8x8xf32> to vector<8x8xf32>
    %cst_30 = arith.constant dense<0.000000e+00> : vector<8x256xf32>
    %42 = tpu.matmul %41, %39, %cst_30 {dimension_numbers = #tpu.dot_dimension_numbers<[1], [0], [0], [1], [0, 0, 1, 1], [], []>} : vector<8x8xf32>, vector<8x256xf32>, vector<8x256xf32> -> vector<8x256xf32>
    %43 = arith.addf %35, %42 : vector<8x256xf32>
    %c255_i32 = arith.constant 255 : i32
    %44 = tpu.dynamic_rotate %8 by %c255_i32 dim 1 : vector<8x256xf32>, i32 -> vector<8x256xf32>
    %c4_31 = arith.constant 4 : index
    %c0_32 = arith.constant 0 : index
    %45 = vector.load %arg2[%c4_31, %c0_32] : memref<8x256xf32, #tpu.memory_space<vmem>>, vector<1x256xf32>
    %46 = vector.broadcast %45 : vector<1x256xf32> to vector<8x256xf32>
    %47 = arith.mulf %44, %46 : vector<8x256xf32>
    %c5 = arith.constant 5 : index
    %c0_33 = arith.constant 0 : index
    %c0_34 = arith.constant 0 : index
    %48 = vector.load %arg5[%c5, %c0_33, %c0_34] : memref<9x8x8xf32, #tpu.memory_space<vmem>>, vector<1x8x8xf32>
    %49 = vector.shape_cast %48 : vector<1x8x8xf32> to vector<8x8xf32>
    %cst_35 = arith.constant dense<0.000000e+00> : vector<8x256xf32>
    %50 = tpu.matmul %49, %47, %cst_35 {dimension_numbers = #tpu.dot_dimension_numbers<[1], [0], [0], [1], [0, 0, 1, 1], [], []>} : vector<8x8xf32>, vector<8x256xf32>, vector<8x256xf32> -> vector<8x256xf32>
    %51 = arith.addf %43, %50 : vector<8x256xf32>
    %c241_i32 = arith.constant 241 : i32
    %52 = tpu.dynamic_rotate %8 by %c241_i32 dim 1 : vector<8x256xf32>, i32 -> vector<8x256xf32>
    %c5_36 = arith.constant 5 : index
    %c0_37 = arith.constant 0 : index
    %53 = vector.load %arg2[%c5_36, %c0_37] : memref<8x256xf32, #tpu.memory_space<vmem>>, vector<1x256xf32>
    %54 = vector.broadcast %53 : vector<1x256xf32> to vector<8x256xf32>
    %55 = arith.mulf %52, %54 : vector<8x256xf32>
    %c6 = arith.constant 6 : index
    %c0_38 = arith.constant 0 : index
    %c0_39 = arith.constant 0 : index
    %56 = vector.load %arg5[%c6, %c0_38, %c0_39] : memref<9x8x8xf32, #tpu.memory_space<vmem>>, vector<1x8x8xf32>
    %57 = vector.shape_cast %56 : vector<1x8x8xf32> to vector<8x8xf32>
    %cst_40 = arith.constant dense<0.000000e+00> : vector<8x256xf32>
    %58 = tpu.matmul %57, %55, %cst_40 {dimension_numbers = #tpu.dot_dimension_numbers<[1], [0], [0], [1], [0, 0, 1, 1], [], []>} : vector<8x8xf32>, vector<8x256xf32>, vector<8x256xf32> -> vector<8x256xf32>
    %59 = arith.addf %51, %58 : vector<8x256xf32>
    %c240_i32 = arith.constant 240 : i32
    %60 = tpu.dynamic_rotate %8 by %c240_i32 dim 1 : vector<8x256xf32>, i32 -> vector<8x256xf32>
    %c6_41 = arith.constant 6 : index
    %c0_42 = arith.constant 0 : index
    %61 = vector.load %arg2[%c6_41, %c0_42] : memref<8x256xf32, #tpu.memory_space<vmem>>, vector<1x256xf32>
    %62 = vector.broadcast %61 : vector<1x256xf32> to vector<8x256xf32>
    %63 = arith.mulf %60, %62 : vector<8x256xf32>
    %c7 = arith.constant 7 : index
    %c0_43 = arith.constant 0 : index
    %c0_44 = arith.constant 0 : index
    %64 = vector.load %arg5[%c7, %c0_43, %c0_44] : memref<9x8x8xf32, #tpu.memory_space<vmem>>, vector<1x8x8xf32>
    %65 = vector.shape_cast %64 : vector<1x8x8xf32> to vector<8x8xf32>
    %cst_45 = arith.constant dense<0.000000e+00> : vector<8x256xf32>
    %66 = tpu.matmul %65, %63, %cst_45 {dimension_numbers = #tpu.dot_dimension_numbers<[1], [0], [0], [1], [0, 0, 1, 1], [], []>} : vector<8x8xf32>, vector<8x256xf32>, vector<8x256xf32> -> vector<8x256xf32>
    %67 = arith.addf %59, %66 : vector<8x256xf32>
    %c239_i32 = arith.constant 239 : i32
    %68 = tpu.dynamic_rotate %8 by %c239_i32 dim 1 : vector<8x256xf32>, i32 -> vector<8x256xf32>
    %c7_46 = arith.constant 7 : index
    %c0_47 = arith.constant 0 : index
    %69 = vector.load %arg2[%c7_46, %c0_47] : memref<8x256xf32, #tpu.memory_space<vmem>>, vector<1x256xf32>
    %70 = vector.broadcast %69 : vector<1x256xf32> to vector<8x256xf32>
    %71 = arith.mulf %68, %70 : vector<8x256xf32>
    %c8 = arith.constant 8 : index
    %c0_48 = arith.constant 0 : index
    %c0_49 = arith.constant 0 : index
    %72 = vector.load %arg5[%c8, %c0_48, %c0_49] : memref<9x8x8xf32, #tpu.memory_space<vmem>>, vector<1x8x8xf32>
    %73 = vector.shape_cast %72 : vector<1x8x8xf32> to vector<8x8xf32>
    %cst_50 = arith.constant dense<0.000000e+00> : vector<8x256xf32>
    %74 = tpu.matmul %73, %71, %cst_50 {dimension_numbers = #tpu.dot_dimension_numbers<[1], [0], [0], [1], [0, 0, 1, 1], [], []>} : vector<8x8xf32>, vector<8x256xf32>, vector<8x256xf32> -> vector<8x256xf32>
    %75 = arith.addf %67, %74 : vector<8x256xf32>
    %c0_51 = arith.constant 0 : index
    %c0_52 = arith.constant 0 : index
    %76 = vector.load %arg6[%c0_51, %c0_52] : memref<8x1xf32, #tpu.memory_space<vmem>>, vector<8x1xf32>
    %77 = vector.broadcast %76 : vector<8x1xf32> to vector<8x256xf32>
    %78 = arith.addf %75, %77 : vector<8x256xf32>
    %cst_53 = arith.constant 0.000000e+00 : f32
    %79 = vector.broadcast %cst_53 : f32 to vector<8x256xf32>
    %80 = arith.maximumf %78, %79 : vector<8x256xf32>
    %c0_54 = arith.constant 0 : index
    %c0_55 = arith.constant 0 : index
    %81 = vector.load %arg7[%c0_54, %c0_55] : memref<4x8xf32, #tpu.memory_space<vmem>>, vector<4x8xf32>
    %cst_56 = arith.constant dense<0.000000e+00> : vector<4x256xf32>
    %82 = tpu.matmul %81, %80, %cst_56 {dimension_numbers = #tpu.dot_dimension_numbers<[1], [0], [0], [1], [0, 0, 1, 1], [], []>} : vector<4x8xf32>, vector<8x256xf32>, vector<4x256xf32> -> vector<4x256xf32>
    %c0_57 = arith.constant 0 : index
    %c0_58 = arith.constant 0 : index
    %83 = vector.load %arg8[%c0_57, %c0_58] : memref<4x1xf32, #tpu.memory_space<vmem>>, vector<4x1xf32>
    %84 = vector.broadcast %83 : vector<4x1xf32> to vector<4x256xf32>
    %85 = arith.addf %82, %84 : vector<4x256xf32>
    %86 = arith.addf %85, %1 : vector<4x256xf32>
    %cst_59 = arith.constant 0.000000e+00 : f32
    %87 = vector.broadcast %cst_59 : f32 to vector<4x256xf32>
    %88 = arith.maximumf %86, %87 : vector<4x256xf32>
    %c0_60 = arith.constant 0 : index
    %c0_61 = arith.constant 0 : index
    %c0_62 = arith.constant 0 : index
    %89 = vector.load %arg9[%c0_60, %c0_61, %c0_62] : memref<1x4x256xf32, #tpu.memory_space<vmem>>, vector<1x4x256xf32>
    %90 = vector.shape_cast %89 : vector<1x4x256xf32> to vector<4x256xf32>
    %91 = vector.shape_cast %88 : vector<4x256xf32> to vector<1x4x256xf32>
    tpu.vector_store %arg9[%c0_60, %c0_61, %c0_62], %91 {strides = array<i32>} : memref<1x4x256xf32, #tpu.memory_space<vmem>>, vector<1x4x256xf32>,
    return
  }
  func.func @transform_0(%arg0: i32) -> (i32, i32, i32) {
    %c0_i32 = arith.constant 0 : i32
    %c0_i32_0 = arith.constant 0 : i32
    %c0_i32_1 = arith.constant 0 : i32
    return %arg0, %c0_i32, %c0_i32_0 : i32, i32, i32
  }
  func.func @transform_1(%arg0: i32) -> (i32, i32) {
    %c0_i32 = arith.constant 0 : i32
    %c0_i32_0 = arith.constant 0 : i32
    %c0_i32_1 = arith.constant 0 : i32
    return %c0_i32, %c0_i32_0 : i32, i32
  }
  func.func @transform_2(%arg0: i32) -> (i32, i32) {
    %c0_i32 = arith.constant 0 : i32
    %c0_i32_0 = arith.constant 0 : i32
    %c0_i32_1 = arith.constant 0 : i32
    return %c0_i32, %c0_i32_0 : i32, i32
  }
  func.func @transform_3(%arg0: i32) -> (i32, i32) {
    %c0_i32 = arith.constant 0 : i32
    %c0_i32_0 = arith.constant 0 : i32
    %c0_i32_1 = arith.constant 0 : i32
    return %c0_i32, %c0_i32_0 : i32, i32
  }
  func.func @transform_4(%arg0: i32) -> (i32, i32, i32) {
    %c0_i32 = arith.constant 0 : i32
    %c0_i32_0 = arith.constant 0 : i32
    %c0_i32_1 = arith.constant 0 : i32
    %c0_i32_2 = arith.constant 0 : i32
    return %c0_i32, %c0_i32_0, %c0_i32_1 : i32, i32, i32
  }
  func.func @transform_5(%arg0: i32) -> (i32, i32) {
    %c0_i32 = arith.constant 0 : i32
    %c0_i32_0 = arith.constant 0 : i32
    %c0_i32_1 = arith.constant 0 : i32
    return %c0_i32, %c0_i32_0 : i32, i32
  }
  func.func @transform_6(%arg0: i32) -> (i32, i32) {
    %c0_i32 = arith.constant 0 : i32
    %c0_i32_0 = arith.constant 0 : i32
    %c0_i32_1 = arith.constant 0 : i32
    return %c0_i32, %c0_i32_0 : i32, i32
  }
  func.func @transform_7(%arg0: i32) -> (i32, i32) {
    %c0_i32 = arith.constant 0 : i32
    %c0_i32_0 = arith.constant 0 : i32
    %c0_i32_1 = arith.constant 0 : i32
    return %c0_i32, %c0_i32_0 : i32, i32
  }
  func.func @transform_8(%arg0: i32) -> (i32, i32, i32) {
    %c0_i32 = arith.constant 0 : i32
    %c0_i32_0 = arith.constant 0 : i32
    %c0_i32_1 = arith.constant 0 : i32
    return %arg0, %c0_i32, %c0_i32_0 : i32, i32, i32
  }
}

</mosaic_0001>

<bundles_post_ra>
// kernel: bottleneck_forward.1
= control target key start
LH: loop header
LB: loop body
LE: loop exit
PB: predicated region body
PF: predicated region fallthrough
CT: control target
= control target key end

     0   :  { %s1570_s27 = smov 0   ;;  %s1751_s0 = inlined_call_operand.vmem [shape: f32[2,4,256], index: 0, kind: input, shape index: {}]   ;;  %s1752_s1 = inlined_call_operand.vmem [shape: f32[8,256], index: 1, kind: input, shape index: {}]   ;;  %s1753_s2 = inlined_call_operand.vmem [shape: f32[8,4], index: 2, kind: input, shape index: {}]   ;;  %s1754_s3 = inlined_call_operand.vmem [shape: f32[8,1], index: 3, kind: input, shape index: {}]   ;;  %s1755_s4 = inlined_call_operand.vmem [shape: f32[9,8,8], index: 4, kind: input, shape index: {}]   ;;  %s1756_s5 = inlined_call_operand.vmem [shape: f32[8,1], index: 5, kind: input, shape index: {}]   ;;  %s1757_s6 = inlined_call_operand.vmem [shape: f32[4,8], index: 6, kind: input, shape index: {}]   ;;  %s1758_s7 = inlined_call_operand.vmem [shape: f32[4,1], index: 7, kind: input, shape index: {}]   ;;  %s1759_s8 = inlined_call_operand.vmem [shape: f32[2,4,256], index: 8, kind: output, shape index: {}]  }
   0x1 LB: > { %s1429_s28 = sadd.s32 4294967295, %s1513_s27   ;;  %p1433_p0 = scmp.ge.s32.totalorder %s1513_s27, 1  ;;  %s1513_s27 = sphi %s1570_s27, %s18_s27  }
   0x2   : > { %p262_p1 = scmp.lt.s32.totalorder %s1513_s27, 3 }
   0x4   : > { %p263_p2 = pnand %p1433_p0, %p262_p1 }
   0x5   : > { %p296_p3 = scmp.lt.s32.totalorder (!%p263_p2), %s1429_s28, 1  ;;  %v1515_v0 = vmov (!%p263_p2), 0.0   ;;  %v1516_v1 = vmov (!%p263_p2), 0   ;;  %v308_v2 = vld [vmem:[%s1754_s3] sm:$0xff] (!%p263_p2)  ;;  %vm320_vm0 = vcmask (!%p263_p2), 1043456   ;;  %vm316_vm1 = vcmask (!%p263_p2), 31744  }
   0x6   : > { %266 = sbr.rel (%p263_p2) target bundleno = 841 (0x349), region = 52  ;;  %389 = vmatprep.mubr.f32.mxu0 (!%p263_p2), %v1515_v0  ;;  %1504 = vset.pattern.permute.xlu0 (!%p263_p2), %v1516_v1  ;;  %v307_v5 = vld [vmem:[%s1753_s2] sm:$0xff] (!%p263_p2)  ;;  %s1517_s15 = smov (!%p263_p2), 15   ;;  %v404_v15 = vlaneseq (!%p263_p2)  ;;  %vm424_vm4 = vcmask (!%p263_p2), 64512   ;;  %v1448_v33 = vld [vmem:[%s1755_s4 + $0x10] sm:$0xff] (!%p263_p2)  ;;  %v1451_v51 = vld [vmem:[%s1755_s4 + $0x18] sm:$0xff] (!%p263_p2) }
   0x7   : > { %311 = vperm.xlu0 (!%p263_p2), %1504, %v308_v2   ;;  %764 = vmatprep.mubr.f32.mxu1 (!%p263_p2), %v1515_v0  ;;  %s1518_s16 = smov (!%p263_p2), 1   ;;  %s1519_s17 = smov (!%p263_p2), 127   ;;  %v1284_v13 = vld [vmem:[%s1758_s7] sm:$0xf] (!%p263_p2) }
   0x8   : > { %1505 = vset.pattern.permute.xlu1 (!%p263_p2), %v1516_v1  ;;  %s1520_s18 = smov (!%p263_p2), 17   ;;  %s1521_s19 = smov (!%p263_p2), 113   ;;  %v1273_v14 = vld [vmem:[%s1756_s5] sm:$0xff] (!%p263_p2)  ;;  %v412_v16 = vshrl.u32 (!%p263_p2), %v404_v15, 7  ;;  %v1629_v17 = vand.u32 (!%p263_p2), 127, %v404_v15 }
   0x9   : > { %s1522_s20 = smov (!%p263_p2), 112   ;;  %s1523_s21 = smov (!%p263_p2), 16   ;;  %v1447_v20 = vld [vmem:[%s1752_s1 + $0x2] ss:$8 sm:$0x3] (!%p263_p2) }
   0xa   : > { %s1524_s22 = smov (!%p263_p2), 111   ;;  %v1631_v18 = vsub.s32 (!%p263_p2), 0, %v412_v16  ;;  %v1633_v19 = vsub.s32 (!%p263_p2), 1, %v412_v16  ;;  %vm677_vm2 = vcmp.lt.s32.totalorder (!%p263_p2), %v1629_v17, 15  ;;  %vm777_vm3 = vcmp.lt.s32.totalorder (!%p263_p2), %v1629_v17, 1  ;;  %v423_v61 = vld [vmem:[%s1755_s4] sm:$0xff] (!%p263_p2) }
   0xb   : > { %v1450_v24 = vld [vmem:[%s1752_s1 + $0x3] ss:$8 sm:$0x3] (!%p263_p2)  ;;  %v1453_v34 = vld [vmem:[%s1752_s1 + $0x4] ss:$8 sm:$0x3] (!%p263_p2) }
   0xc   : > { %v690_v21 = vrot.slane (!%p263_p2), %v1447_v20, %v1633_v19  ;;  %v686_v22 = vrot.slane (!%p263_p2), %v1447_v20, %v1631_v18  ;;  %v786_v28 = vrot.slane (!%p263_p2), %v1450_v24, %v1631_v18  ;;  %v790_v29 = vrot.slane (!%p263_p2), %v1450_v24, %v1633_v19  ;;  %v409_v42 = vld [vmem:[%s1752_s1] ss:$8 sm:$0x3] (!%p263_p2)  ;;  %v1456_v52 = vld [vmem:[%s1752_s1 + $0x5] ss:$8 sm:$0x3] (!%p263_p2) }
   0xd   : > { %s1761_s28 = smov (!%p296_p3, %s1429_s28), 1  ;;  %vm877_vm5 = vcmp.lt.s32.totalorder %v1629_v17, 127  ;;  %v890_v40 = vrot.slane %v1453_v34, %v1633_v19  ;;  %v886_v44 = vrot.slane %v1453_v34, %v1631_v18  ;;  %vm406_vm6 = vcmp.lt.s32.totalorder %v1629_v17, 17  ;;  %v1459_v62 = vld [vmem:[%s1752_s1 + $0x6] ss:$8 sm:$0x3] }
   0xe   : > { %s1468_s9 = sshll.u32 %s1761_s28, 3  ;;  %v414_v48 = vrot.slane %v409_v42, %v1631_v18  ;;  %v418_v49 = vrot.slane %v409_v42, %v1633_v19  ;;  %vm977_vm7 = vcmp.lt.s32.totalorder %v1629_v17, 113  ;;  %v990_v59 = vrot.slane %v1456_v52, %v1633_v19 }
   0xf   : > { %s300_s12 = scalar_lea.vmem %s1751_s0, %s1468_s9  ;;  %v986_v1 = vrot.slane %v1456_v52, %v1631_v18  ;;  %vm1077_vm8 = vcmp.lt.s32.totalorder %v1629_v17, 112  ;;  %vm577_vm9 = vcmp.lt.s32.totalorder %v1629_v17, 16  ;;  %v1086_v24 = vrot.slane %v1459_v62, %v1631_v18  ;;  %s305_s29 = scalar_lea.vmem %s1759_s8, %s1468_s9 }
  0x10   : > { %v1591_v3 = vld [vmem:[%s300_s12] sm:$0xff]  ;;  %vm1177_vm10 = vcmp.lt.s32.totalorder %v1629_v17, 111 }
  0x11   : > { %v1595_v4 = vcombine.high %v1591_v3, %v1591_v3 }
  0x13   : > { %1438 = vmatprep.subr.msk.mxu0 %vm320_vm0, %v1595_v4 }
  0x14   : > { %1439 = vmatpush1.msk.msra.mxu0 %vm320_vm0, %v1591_v3 }
  0x15   : > { %1440 = vmatmul.mubr.msk.f32.vlgmr.msra.gmra.mrb[0].mxu0 %vm316_vm1, %v307_v5 }
  0x16   : > { %492 = vmatprep.mubr.f32.mxu0 %v1515_v0 }
  0x86   : > { %v312_v6 = vpop.permute.xlu0 %311 }
  0xe8   : > { %v391_v7 = vpop.f32.mrb[0].mxu0 }
  0xe9   : > { %v392_v8 = vadd.f32 %v391_v7, %v312_v6  ;;  %v393_v9 = vpop.f32.mrb[1].mxu0  ;;  %v1090_v7 = vrot.slane %v1459_v62, %v1633_v19 }
  0xea   : > { %v394_v10 = vadd.f32 %v393_v9, %v312_v6  ;;  %v1454_v9 = vld [vmem:[%s1755_s4 + $0x28] sm:$0xff] }
  0xeb   : > { %v1603_v11 = vmax.f32 %v392_v8, 0.0 }
  0xec   : > { %v1605_v12 = vmax.f32 %v394_v10, 0.0  ;;  %v1444_v10 = vld [vmem:[%s1752_s1 + $0x1] ss:$8 sm:$0x3] }
  0xed   : > { %673 = vrot.lane.b32.xlu0 %v1603_v11, %s1517_s15  ;;  %v590_v16 = vrot.slane %v1444_v10, %v1633_v19 }
  0xee   : > { %675 = vrot.lane.b32.xlu1 %v1605_v12, %s1517_s15 }
  0xf1   : > { %775 = vrot.lane.b32.xlu0 %v1605_v12, %s1518_s16 }
  0xf2   : > { %773 = vrot.lane.b32.xlu1 %v1603_v11, %s1518_s16 }
  0xf5   : > { %875 = vrot.lane.b32.xlu0 %v1605_v12, %s1519_s17 }
  0xf6   : > { %873 = vrot.lane.b32.xlu1 %v1603_v11, %s1519_s17 }
  0xf9   : > { %402 = vrot.lane.b32.xlu0 %v1605_v12, %s1520_s18 }
  0xfa   : > { %400 = vrot.lane.b32.xlu1 %v1603_v11, %s1520_s18 }
  0xfd   : > { %975 = vrot.lane.b32.xlu0 %v1605_v12, %s1521_s19 }
  0xfe   : > { %973 = vrot.lane.b32.xlu1 %v1603_v11, %s1521_s19 }
 0x101   : > { %1075 = vrot.lane.b32.xlu0 %v1605_v12, %s1522_s20 }
 0x102   : > { %1073 = vrot.lane.b32.xlu1 %v1603_v11, %s1522_s20 }
 0x105   : > { %575 = vrot.lane.b32.xlu0 %v1605_v12, %s1523_s21 }
 0x106   : > { %573 = vrot.lane.b32.xlu1 %v1603_v11, %s1523_s21 }
 0x109   : > { %1175 = vrot.lane.b32.xlu0 %v1605_v12, %s1524_s22 }
 0x10a   : > { %1173 = vrot.lane.b32.xlu1 %v1603_v11, %s1524_s22 }
 0x10d   : > { %1287 = vperm.xlu0 %1504, %v1284_v13  }
 0x10e   : > { %1276 = vperm.xlu1 %1505, %v1273_v14  }
 0x15f   : > { %v674_v23 = vpop.permute.xlu0 %673 }
 0x160   : > { %v676_v25 = vpop.permute.xlu1 %675 }
 0x161   : > { %v679_v26 = vsel %vm677_vm2, %v676_v25, %v674_v23  ;;  %v678_v27 = vsel %vm677_vm2, %v674_v23, %v676_v25 }
 0x162   : > { %v694_v30 = vmul.f32 %v690_v21, %v678_v27  ;;  %v693_v31 = vmul.f32 %v686_v22, %v679_v26  ;;  %v1441_v21 = vld [vmem:[%s1755_s4 + $0x20] sm:$0xff] }
 0x163   : > { %v776_v32 = vpop.permute.xlu0 %775  ;;  %v1462_v22 = vld [vmem:[%s1752_s1 + $0x7] ss:$8 sm:$0x3] }
 0x164   : > { %v774_v35 = vpop.permute.xlu1 %773  ;;  %700 = vmatprep.subr.mxu1 %v694_v30  ;;  %v1190_v30 = vrot.slane %v1462_v22, %v1633_v19  ;;  %v1445_v19 = vld [vmem:[%s1755_s4 + $0x8] sm:$0xff] }
 0x165   : > { %v778_v36 = vsel %vm777_vm3, %v774_v35, %v776_v32  ;;  %v779_v37 = vsel %vm777_vm3, %v776_v32, %v774_v35  ;;  %701 = vmatpush1.msra.mxu1 %v693_v31  ;;  %v1457_v32 = vld [vmem:[%s1755_s4 + $0x30] sm:$0xff] }
 0x166   : > { %v793_v38 = vmul.f32 %v786_v28, %v779_v37  ;;  %v794_v39 = vmul.f32 %v790_v29, %v778_v36  ;;  %1449 = vmatmul.mubr.msk.f32.vlgmr.msra.gmra.mrb[0].mxu1 %vm424_vm4, %v1448_v33  ;;  %v1186_v37 = vrot.slane %v1462_v22, %v1631_v18 }
 0x167   : > { %v876_v41 = vpop.permute.xlu0 %875  ;;  %864 = vmatprep.mubr.f32.mxu1 %v1515_v0 }
 0x168   : > { %v874_v43 = vpop.permute.xlu1 %873  ;;  %800 = vmatprep.subr.mxu1 %v794_v39  ;;  %v1460_v39 = vld [vmem:[%s1755_s4 + $0x38] sm:$0xff] }
 0x169   : > { %v879_v45 = vsel %vm877_vm5, %v876_v41, %v874_v43  ;;  %801 = vmatpush1.msra.mxu1 %v793_v38  ;;  %v878_v46 = vsel %vm877_vm5, %v874_v43, %v876_v41 }
 0x16a   : > { %v894_v47 = vmul.f32 %v890_v40, %v879_v45  ;;  %v893_v54 = vmul.f32 %v886_v44, %v878_v46 }
 0x16b   : > { %v403_v50 = vpop.permute.xlu0 %402 }
 0x16c   : > { %v401_v53 = vpop.permute.xlu1 %400  ;;  %900 = vmatprep.subr.mxu1 %v894_v47 }
 0x16d   : > { %v407_v55 = vsel %vm406_vm6, %v401_v53, %v403_v50  ;;  %v408_v56 = vsel %vm406_vm6, %v403_v50, %v401_v53 }
 0x16e   : > { %v421_v57 = vmul.f32 %v414_v48, %v408_v56  ;;  %v422_v58 = vmul.f32 %v418_v49, %v407_v55  ;;  %1452 = vmatmul.mubr.msk.f32.vlgmr.msra.gmra.mrb[0].mxu1 %vm424_vm4, %v1451_v51 }
 0x16f   : > { %901 = vmatpush1.msra.mxu1 %v893_v54  ;;  %v976_v60 = vpop.permute.xlu0 %975  ;;  %964 = vmatprep.mubr.f32.mxu1 %v1515_v0 }
 0x170   : > { %v974_v63 = vpop.permute.xlu1 %973  ;;  %428 = vmatprep.subr.mxu0 %v422_v58 }
 0x171   : > { %v979_v2 = vsel %vm977_vm7, %v976_v60, %v974_v63  ;;  %429 = vmatpush1.msra.mxu0 %v421_v57  ;;  %v978_v5 = vsel %vm977_vm7, %v974_v63, %v976_v60 }
 0x172   : > { %v994_v6 = vmul.f32 %v990_v59, %v979_v2  ;;  %1442 = vmatmul.mubr.msk.f32.vlgmr.msra.gmra.mrb[2].mxu0 %vm424_vm4, %v423_v61  ;;  %502 = vmatprep.subr.mxu0 %v1605_v12  ;;  %v993_v12 = vmul.f32 %v986_v1, %v978_v5 }
 0x173   : > { %503 = vmatpush1.msra.mxu0 %v1603_v11  ;;  %v1076_v8 = vpop.permute.xlu0 %1075  ;;  %566 = vmatprep.mubr.f32.mxu0 %v1515_v0  ;;  %v586_v11 = vrot.slane %v1444_v10, %v1631_v18  ;;  %v1463_v18 = vld [vmem:[%s1755_s4 + $0x40] sm:$0xff] }
 0x174   : > { %v1074_v13 = vpop.permute.xlu1 %1073  ;;  %1000 = vmatprep.subr.mxu1 %v994_v6 }
 0x175   : > { %v1079_v14 = vsel %vm1077_vm8, %v1076_v8, %v1074_v13  ;;  %v1078_v27 = vsel %vm1077_vm8, %v1074_v13, %v1076_v8 }
 0x176   : > { %v1094_v15 = vmul.f32 %v1090_v7, %v1079_v14  ;;  %1455 = vmatmul.mubr.msk.f32.vlgmr.msra.gmra.mrb[0].mxu1 %vm424_vm4, %v1454_v9  ;;  %v1093_v34 = vmul.f32 %v1086_v24, %v1078_v27 }
 0x177   : > { %1001 = vmatpush1.msra.mxu1 %v993_v12  ;;  %v576_v20 = vpop.permute.xlu0 %575  ;;  %1064 = vmatprep.mubr.f32.mxu1 %v1515_v0 }
 0x178   : > { %v574_v23 = vpop.permute.xlu1 %573  ;;  %1100 = vmatprep.subr.mxu1 %v1094_v15 }
 0x179   : > { %v578_v25 = vsel %vm577_vm9, %v574_v23, %v576_v20  ;;  %v579_v26 = vsel %vm577_vm9, %v576_v20, %v574_v23 }
 0x17a   : > { %v593_v28 = vmul.f32 %v586_v11, %v579_v26  ;;  %v594_v29 = vmul.f32 %v590_v16, %v578_v25  ;;  %1443 = vmatmul.mubr.msk.f32.vlgmr.msra.gmra.mrb[2].mxu0 %vm424_vm4, %v1441_v21 }
 0x17b   : > { %v1176_v31 = vpop.permute.xlu0 %1175  ;;  %664 = vmatprep.mubr.f32.mxu0 %v1515_v0 }
 0x17c   : > { %v1174_v33 = vpop.permute.xlu1 %1173  ;;  %600 = vmatprep.subr.mxu0 %v594_v29 }
 0x17d   : > { %v1179_v35 = vsel %vm1177_vm10, %v1176_v31, %v1174_v33  ;;  %601 = vmatpush1.msra.mxu0 %v593_v28  ;;  %v1178_v38 = vsel %vm1177_vm10, %v1174_v33, %v1176_v31 }
 0x17e   : > { %v1194_v36 = vmul.f32 %v1190_v30, %v1179_v35  ;;  %1458 = vmatmul.mubr.msk.f32.vlgmr.msra.gmra.mrb[0].mxu1 %vm424_vm4, %v1457_v32  ;;  %v1193_v40 = vmul.f32 %v1186_v37, %v1178_v38 }
 0x17f   : > { %1101 = vmatpush1.msra.mxu1 %v1093_v34  ;;  %1164 = vmatprep.mubr.f32.mxu1 %v1515_v0 }
 0x180   : > { %1200 = vmatprep.subr.mxu1 %v1194_v36 }
 0x182   : > { %1446 = vmatmul.mubr.msk.f32.vlgmr.msra.gmra.mrb[2].mxu0 %vm424_vm4, %v1445_v19 }
 0x183   : > { %1357 = vmatprep.mubr.f32.mxu0 %v1515_v0 }
 0x186   : > { %1461 = vmatmul.mubr.msk.f32.vlgmr.msra.gmra.mrb[0].mxu1 %vm424_vm4, %v1460_v39 }
 0x187   : > { %1201 = vmatpush1.msra.mxu1 %v1193_v40  ;;  %1264 = vmatprep.mubr.f32.mxu1 %v1515_v0  ;;  %v1283_v0 = vld [vmem:[%s1757_s6] sm:$0xf] }
 0x18c   : > { %v1288_v51 = vpop.permute.xlu0 %1287 }
 0x18d   : > { %v1277_v43 = vpop.permute.xlu1 %1276 }
 0x18e   : > { %1464 = vmatmul.mubr.msk.f32.vlgmr.msra.gmra.mrb[0].mxu1 %vm424_vm4, %v1463_v18 }
 0x255   : > { %v666_v17 = vpop.f32.mrb[2].mxu0 }
 0x256   : > { %v668_v41 = vpop.f32.mrb[3].mxu0 }
 0x261   : > { %v1266_v42 = vpop.f32.mrb[0].mxu1 }
 0x262   : > { %v1470_v44 = vadd.f32 %v1266_v42, %v666_v17  ;;  %v1268_v45 = vpop.f32.mrb[1].mxu1 }
 0x263   : > { %v1471_v46 = vadd.f32 %v1268_v45, %v668_v41 }
 0x264   : > { %v1279_v47 = vadd.f32 %v1470_v44, %v1277_v43 }
 0x265   : > { %v1280_v48 = vadd.f32 %v1471_v46, %v1277_v43 }
 0x266   : > { %v1281_v50 = vmax.f32 %v1279_v47, 0.0 }
 0x267   : > { %v1282_v49 = vmax.f32 %v1280_v48, 0.0 }
 0x269   : > { %1293 = vmatprep.subr.mxu0 %v1282_v49 }
 0x26a   : > { %1294 = vmatpush1.msra.mxu0 %v1281_v50 }
 0x26b   : > { %1465 = vmatmul.mubr.msk.f32.vlgmr.msra.gmra.mrb[4].mxu0 %vm424_vm4, %v1283_v0 }
 0x33e   : > { %v1359_v52 = vpop.f32.mrb[4].mxu0 }
 0x33f   : > { %v1360_v53 = vadd.f32 %v1359_v52, %v1288_v51  ;;  %v1361_v54 = vpop.f32.mrb[5].mxu0 }
 0x340   : > { %v1362_v55 = vadd.f32 %v1361_v54, %v1288_v51 }
 0x341   : > { %v1365_v56 = vadd.f32 %v1360_v53, %v1591_v3 }
 0x342   : > { %v1366_v57 = vadd.f32 %v1362_v55, %v1595_v4 }
 0x343   : > { %v1367_v58 = vmax.f32 %v1365_v56, 0.0 }
 0x344   : > { %v1368_v59 = vmax.f32 %v1366_v57, 0.0 }
 0x346   : > { %v1371_v60 = vcombine.low %v1367_v58, %v1368_v59 }
 0x348   : > { %1373 = vst [vmem:[%s305_s29] sm:$0xff] %v1371_v60 }
 0x349 PF: > { %s18_s27 = sadd.s32 1, %s1513_s27  }
 0x34a   : > { %p15_p4 = scmp.ge.s32.totalorder %s18_s27, 4  }
 0x34c   :  { %17 = sbr.rel (!%p15_p4) target bundleno = 1 (0x1), region = 97 }

</bundles_post_ra>
